<compile_context>
chip_gen: v6e
topology: v6e:2x2x1
jax: 0.10.0
libtpu: 0.0.40
codegen_flags: <defaults>
</compile_context>

<pallas_src>
from functools import partial

import jax
import jax.numpy as jnp
from jax.experimental import pallas as pl
from jax.experimental.pallas import tpu as pltpu

EPS = 1e-5
INV_SQRT2 = 0.7071067811865476


def _make_kernel(approximate_gelu=False):
    def kernel(taps_ref, params_ref, out_ref):
        # taps_ref:   VMEM (N, 4, HW)    the 4 dilated 2x2 conv taps, spatial in lanes
        # params_ref: VMEM (outC, 6)     [w00 w01 w10 w11 | bn_gamma | bn_beta]
        # out_ref:    VMEM (N, outC, HW) batch-major, channels-in-sublanes output
        taps = taps_ref[...]                       # (N, 4, HW)
        params = params_ref[...]                   # (outC, 6)
        w = params[:, 0:4]                         # (outC, 4)
        g = params[None, :, 4:5]                   # (1, outC, 1)
        b = params[None, :, 5:6]                   # (1, outC, 1)

        # 2x2 dilated conv for all channels & batches: 4 broadcasted VPU FMAs.
        # (1, outC, 1) lane-broadcast x (N, 1, HW) sublane-broadcast -> (N, outC, HW)
        acc = w[None, :, 0:1] * taps[:, 0:1, :]
        for t in range(1, 4):
            acc = acc + w[None, :, t:t + 1] * taps[:, t:t + 1, :]
        # NOTE: conv bias intentionally omitted -- it cancels through the BN
        # batch-mean subtraction below.

        # BatchNorm2d training-mode forward: per-channel mean and *biased*
        # variance over (N, H_out, W_out) == axes (0, 2).  Two-pass
        # (mean-subtracted sum of squares) to avoid E[x^2]-m^2 cancellation.
        mean = jnp.mean(acc, axis=(0, 2), keepdims=True)           # (1, outC, 1)
        centered = acc - mean
        var = jnp.mean(centered * centered, axis=(0, 2), keepdims=True)
        y = centered * (jax.lax.rsqrt(var + EPS) * g) + b

        # GELU.  Default: exact erf (bit-parity with PyTorch nn.GELU()).
        # approximate_gelu=True swaps in the tanh form, which routes the
        # transcendental to the otherwise-idle EUP slot.
        if approximate_gelu:
            y = jax.nn.gelu(y, approximate=True)
        else:
            y = 0.5 * y * (1.0 + jax.lax.erf(y * INV_SQRT2))

        out_ref[...] = y

    return kernel


@partial(jax.jit,
         static_argnames=("padding", "dilation", "stride", "approximate_gelu"))
def module_patches(x, conv_w, conv_b, bn_gamma, bn_beta,
                   padding=1, dilation=(1, 2), stride=(1, 1),
                   approximate_gelu=False):
    """Pallas implementation of ModulePatches.forward. x is NCHW with C=1."""
    assert stride == (1, 1), "kernel written for stride (1, 1)"
    N, Cin, H, W = x.shape
    assert Cin == 1
    outC = conv_w.shape[0]
    dh, dw = dilation
    H_out = H + 2 * padding - dh * (2 - 1) - 1 + 1
    W_out = W + 2 * padding - dw * (2 - 1) - 1 + 1
    HW = H_out * W_out

    # ---- wrapper glue (fused under the same jit; layout plumbing only) -----
    xpad = jnp.pad(x[:, 0].astype(jnp.float32),
                   ((0, 0), (padding, padding), (padding, padding)))
    # im2col-lite: extract the 4 dilated taps once, spatial flattened to lanes.
    taps = jnp.stack(
        [xpad[:, kh * dh:kh * dh + H_out, kw * dw:kw * dw + W_out]
         .reshape(N, HW)
         for kh in range(2) for kw in range(2)],
        axis=1)                                             # (N, 4, HW)

    # Pack all per-channel parameters into a single (outC, 6) tile.  The conv
    # bias is dropped: BN's batch-mean subtraction cancels it exactly.
    del conv_b
    params = jnp.concatenate(
        [conv_w.reshape(outC, 4).astype(jnp.float32),
         bn_gamma.reshape(outC, 1).astype(jnp.float32),
         bn_beta.reshape(outC, 1).astype(jnp.float32)],
        axis=1)                                             # (outC, 6)

    out = pl.pallas_call(
        _make_kernel(approximate_gelu=approximate_gelu),
        out_shape=jax.ShapeDtypeStruct((N, outC, HW), jnp.float32),
        in_specs=[
            pl.BlockSpec(memory_space=pltpu.MemorySpace.VMEM),   # taps
            pl.BlockSpec(memory_space=pltpu.MemorySpace.VMEM),   # packed params
        ],
        out_specs=pl.BlockSpec(memory_space=pltpu.MemorySpace.VMEM),
    )(taps, params)

    # (N, outC, H_out*W_out) -> NCHW is a free reshape (no transpose needed).
    return out.reshape(N, outC, H_out, W_out)


def reference(x, conv_w, conv_b, bn_gamma, bn_beta,
              padding=1, dilation=(1, 2)):
    """Pure-JAX reference (same math, no Pallas) for validation."""
    N, _, H, W = x.shape
    outC = conv_w.shape[0]
    dh, dw = dilation
    H_out = H + 2 * padding - dh - 1 + 1
    W_out = W + 2 * padding - dw - 1 + 1
    xp = jnp.pad(x[:, 0], ((0, 0), (padding, padding), (padding, padding)))
    acc = jnp.zeros((N, outC, H_out, W_out), jnp.float32)
    for kh in range(2):
        for kw in range(2):
            tap = xp[:, kh * dh:kh * dh + H_out, kw * dw:kw * dw + W_out]
            acc = acc + tap[:, None] * conv_w[None, :, 0, kh, kw, None, None]
    acc = acc + conv_b[None, :, None, None]
    mean = acc.mean(axis=(0, 2, 3), keepdims=True)
    var = jnp.square(acc - mean).mean(axis=(0, 2, 3), keepdims=True)
    y = (acc - mean) * jax.lax.rsqrt(var + EPS) \
        * bn_gamma[None, :, None, None] + bn_beta[None, :, None, None]
    return 0.5 * y * (1.0 + jax.lax.erf(y * INV_SQRT2))


if __name__ == "__main__":
    key = jax.random.PRNGKey(0)
    k_x, k_w, k_b, k_g, k_be = jax.random.split(key, 5)

    N, Cin, H, W = 2, 1, 16, 16
    outC = 16

    x = jax.random.normal(k_x, (N, Cin, H, W), dtype=jnp.float32)
    conv_w = jax.random.normal(k_w, (outC, Cin, 2, 2), dtype=jnp.float32) * 0.5
    conv_b = jax.random.normal(k_b, (outC,), dtype=jnp.float32) * 0.1
    bn_gamma = 1.0 + 0.1 * jax.random.normal(k_g, (outC,), dtype=jnp.float32)
    bn_beta = 0.1 * jax.random.normal(k_be, (outC,), dtype=jnp.float32)

    out = module_patches(x, conv_w, conv_b, bn_gamma, bn_beta)
    out = jax.block_until_ready(out)

    ref = reference(x, conv_w, conv_b, bn_gamma, bn_beta)
    assert out.shape == (N, outC, H + 1, W), out.shape
    assert jnp.allclose(out, ref, rtol=1e-4, atol=1e-4), \
        float(jnp.max(jnp.abs(out - ref)))

    print("KERNEL_OK")
</pallas_src>

<mosaic_0001>
module attributes {stable_mosaic.version = 11 : i64} {
  func.func @kernel(%arg0: memref<2x4x272xf32, #tpu.memory_space<vmem>>, %arg1: memref<16x6xf32, #tpu.memory_space<vmem>>, %arg2: memref<2x16x272xf32, #tpu.memory_space<vmem>>) attributes {dimension_semantics = [], scalar_prefetch = 0 : i64, scratch_operands = 0 : i64, tpu.core_type = #tpu.core_type<tc>} {
    %c0 = arith.constant 0 : index
    %c0_0 = arith.constant 0 : index
    %c0_1 = arith.constant 0 : index
    %0 = vector.load %arg0[%c0, %c0_0, %c0_1] : memref<2x4x272xf32, #tpu.memory_space<vmem>>, vector<2x4x272xf32>
    %c0_2 = arith.constant 0 : index
    %c0_3 = arith.constant 0 : index
    %1 = vector.load %arg1[%c0_2, %c0_3] : memref<16x6xf32, #tpu.memory_space<vmem>>, vector<16x6xf32>
    %2 = vector.extract_strided_slice %1 {offsets = [0, 0], sizes = [16, 4], strides = [1, 1]} : vector<16x6xf32> to vector<16x4xf32>
    %3 = vector.extract_strided_slice %1 {offsets = [0, 4], sizes = [16, 1], strides = [1, 1]} : vector<16x6xf32> to vector<16x1xf32>
    %4 = vector.shape_cast %3 : vector<16x1xf32> to vector<1x16x1xf32>
    %5 = vector.extract_strided_slice %1 {offsets = [0, 5], sizes = [16, 1], strides = [1, 1]} : vector<16x6xf32> to vector<16x1xf32>
    %6 = vector.shape_cast %5 : vector<16x1xf32> to vector<1x16x1xf32>
    %7 = vector.extract_strided_slice %2 {offsets = [0, 0], sizes = [16, 1], strides = [1, 1]} : vector<16x4xf32> to vector<16x1xf32>
    %8 = vector.shape_cast %7 : vector<16x1xf32> to vector<1x16x1xf32>
    %9 = vector.extract_strided_slice %0 {offsets = [0, 0, 0], sizes = [2, 1, 272], strides = [1, 1, 1]} : vector<2x4x272xf32> to vector<2x1x272xf32>
    %10 = vector.broadcast %8 : vector<1x16x1xf32> to vector<2x16x272xf32>
    %11 = vector.broadcast %9 : vector<2x1x272xf32> to vector<2x16x272xf32>
    %12 = arith.mulf %10, %11 : vector<2x16x272xf32>
    %13 = vector.extract_strided_slice %2 {offsets = [0, 1], sizes = [16, 1], strides = [1, 1]} : vector<16x4xf32> to vector<16x1xf32>
    %14 = vector.shape_cast %13 : vector<16x1xf32> to vector<1x16x1xf32>
    %15 = vector.extract_strided_slice %0 {offsets = [0, 1, 0], sizes = [2, 1, 272], strides = [1, 1, 1]} : vector<2x4x272xf32> to vector<2x1x272xf32>
    %16 = vector.broadcast %14 : vector<1x16x1xf32> to vector<2x16x272xf32>
    %17 = vector.broadcast %15 : vector<2x1x272xf32> to vector<2x16x272xf32>
    %18 = arith.mulf %16, %17 : vector<2x16x272xf32>
    %19 = arith.addf %12, %18 : vector<2x16x272xf32>
    %20 = vector.extract_strided_slice %2 {offsets = [0, 2], sizes = [16, 1], strides = [1, 1]} : vector<16x4xf32> to vector<16x1xf32>
    %21 = vector.shape_cast %20 : vector<16x1xf32> to vector<1x16x1xf32>
    %22 = vector.extract_strided_slice %0 {offsets = [0, 2, 0], sizes = [2, 1, 272], strides = [1, 1, 1]} : vector<2x4x272xf32> to vector<2x1x272xf32>
    %23 = vector.broadcast %21 : vector<1x16x1xf32> to vector<2x16x272xf32>
    %24 = vector.broadcast %22 : vector<2x1x272xf32> to vector<2x16x272xf32>
    %25 = arith.mulf %23, %24 : vector<2x16x272xf32>
    %26 = arith.addf %19, %25 : vector<2x16x272xf32>
    %27 = vector.extract_strided_slice %2 {offsets = [0, 3], sizes = [16, 1], strides = [1, 1]} : vector<16x4xf32> to vector<16x1xf32>
    %28 = vector.shape_cast %27 : vector<16x1xf32> to vector<1x16x1xf32>
    %29 = vector.extract_strided_slice %0 {offsets = [0, 3, 0], sizes = [2, 1, 272], strides = [1, 1, 1]} : vector<2x4x272xf32> to vector<2x1x272xf32>
    %30 = vector.broadcast %28 : vector<1x16x1xf32> to vector<2x16x272xf32>
    %31 = vector.broadcast %29 : vector<2x1x272xf32> to vector<2x16x272xf32>
    %32 = arith.mulf %30, %31 : vector<2x16x272xf32>
    %33 = arith.addf %26, %32 : vector<2x16x272xf32>
    %cst = arith.constant dense<0.000000e+00> : vector<16xf32>
    %34 = vector.multi_reduction <add>, %33, %cst [0, 2] : vector<2x16x272xf32> to vector<16xf32>
    %35 = vector.shape_cast %34 : vector<16xf32> to vector<1x16x1xf32>
    %cst_4 = arith.constant 5.440000e+02 : f32
    %36 = vector.broadcast %cst_4 : f32 to vector<1x16x1xf32>
    %37 = arith.divf %35, %36 : vector<1x16x1xf32>
    %38 = vector.broadcast %37 : vector<1x16x1xf32> to vector<2x16x272xf32>
    %39 = arith.subf %33, %38 : vector<2x16x272xf32>
    %40 = arith.mulf %39, %39 : vector<2x16x272xf32>
    %cst_5 = arith.constant dense<0.000000e+00> : vector<16xf32>
    %41 = vector.multi_reduction <add>, %40, %cst_5 [0, 2] : vector<2x16x272xf32> to vector<16xf32>
    %42 = vector.shape_cast %41 : vector<16xf32> to vector<1x16x1xf32>
    %cst_6 = arith.constant 5.440000e+02 : f32
    %43 = vector.broadcast %cst_6 : f32 to vector<1x16x1xf32>
    %44 = arith.divf %42, %43 : vector<1x16x1xf32>
    %cst_7 = arith.constant 9.99999974E-6 : f32
    %45 = vector.broadcast %cst_7 : f32 to vector<1x16x1xf32>
    %46 = arith.addf %44, %45 : vector<1x16x1xf32>
    %47 = math.rsqrt %46 : vector<1x16x1xf32>
    %48 = arith.mulf %47, %4 : vector<1x16x1xf32>
    %49 = vector.broadcast %48 : vector<1x16x1xf32> to vector<2x16x272xf32>
    %50 = arith.mulf %39, %49 : vector<2x16x272xf32>
    %51 = vector.broadcast %6 : vector<1x16x1xf32> to vector<2x16x272xf32>
    %52 = arith.addf %50, %51 : vector<2x16x272xf32>
    %cst_8 = arith.constant 5.000000e-01 : f32
    %53 = vector.broadcast %cst_8 : f32 to vector<2x16x272xf32>
    %54 = arith.mulf %53, %52 : vector<2x16x272xf32>
    %cst_9 = arith.constant 0.707106769 : f32
    %55 = vector.broadcast %cst_9 : f32 to vector<2x16x272xf32>
    %56 = arith.mulf %52, %55 : vector<2x16x272xf32>
    %57 = math.erf %56 : vector<2x16x272xf32>
    %cst_10 = arith.constant 1.000000e+00 : f32
    %58 = vector.broadcast %cst_10 : f32 to vector<2x16x272xf32>
    %59 = arith.addf %58, %57 : vector<2x16x272xf32>
    %60 = arith.mulf %54, %59 : vector<2x16x272xf32>
    %c0_11 = arith.constant 0 : index
    %c0_12 = arith.constant 0 : index
    %c0_13 = arith.constant 0 : index
    %61 = vector.load %arg2[%c0_11, %c0_12, %c0_13] : memref<2x16x272xf32, #tpu.memory_space<vmem>>, vector<2x16x272xf32>
    tpu.vector_store %arg2[%c0_11, %c0_12, %c0_13], %60 {strides = array<i32>} : memref<2x16x272xf32, #tpu.memory_space<vmem>>, vector<2x16x272xf32>,
    return
  }
}

</mosaic_0001>

<bundles_post_ra>
// kernel: module_patches.1
= control target key start
LH: loop header
LB: loop body
LE: loop exit
PB: predicated region body
PF: predicated region fallthrough
CT: control target
= control target key end

     0   :  { %v589_v0 = vmov 1   ;;  %v590_v1 = vmov 0   ;;  %v591_v4 = vmov 2   ;;  %v592_v5 = vmov 3   ;;  %s778_s1 = inlined_call_operand.vmem [shape: f32[16,6], index: 1, kind: input, shape index: {}]   ;;  %s779_s0 = inlined_call_operand.vmem [shape: f32[2,4,272], index: 0, kind: input, shape index: {}]   ;;  %s780_s2 = inlined_call_operand.vmem [shape: f32[2,16,272], index: 2, kind: output, shape index: {}]  }
   0x1   :  { %552 = vset.pattern.permute.xlu1 %v589_v0  ;;  %551 = vset.pattern.permute.xlu0 %v590_v1  ;;  %v613_v2 = vld [vmem:[%s778_s1] sm:$0xff]  ;;  %v620_v3 = vld [vmem:[%s778_s1 + $0x8] sm:$0xff]  ;;  %v31_v6 = vlaneseq  ;;  %v14_v34 = vld [vmem:[%s779_s0 + $0x14] sm:$0xf]  ;;  %vm356_vm0 = vcmask 130048  }
   0x2   :  { %98 = vperm.xlu1 %552, %v613_v2   ;;  %19 = vperm.xlu0 %551, %v613_v2   ;;  %v11_v10 = vld [vmem:[%s779_s0] sm:$0xff]  ;;  %v12_v11 = vld [vmem:[%s779_s0 + $0x8] sm:$0xf]  ;;  %v13_v14 = vld [vmem:[%s779_s0 + $0xc] sm:$0xff] }
   0x3   :  { %v32_v7 = vshrl.u32 %v31_v6, 7 }
   0x5   :  { %v107_v8 = vsub.s32 1, %v32_v7  ;;  %v111_v9 = vsub.s32 5, %v32_v7  ;;  %v33_v12 = vsub.s32 0, %v32_v7  ;;  %v37_v13 = vsub.s32 4, %v32_v7 }
   0x6   :  { %102 = vperm.xlu1 %552, %v620_v3   ;;  %24 = vperm.xlu0 %551, %v620_v3   ;;  %v193_v23 = vsub.s32 2, %v32_v7  ;;  %v197_v24 = vsub.s32 6, %v32_v7  ;;  %v279_v25 = vsub.s32 3, %v32_v7  ;;  %v283_v26 = vsub.s32 7, %v32_v7 }
   0x7   :  { %v108_v15 = vrot.slane %v11_v10, %v107_v8  ;;  %v112_v16 = vrot.slane %v11_v10, %v111_v9  ;;  %v116_v17 = vrot.slane %v12_v11, %v107_v8  ;;  %v120_v18 = vrot.slane %v13_v14, %v107_v8 }
   0x8   :  { %v34_v19 = vrot.slane %v11_v10, %v33_v12  ;;  %v38_v20 = vrot.slane %v11_v10, %v37_v13  ;;  %v42_v21 = vrot.slane %v12_v11, %v33_v12  ;;  %v46_v22 = vrot.slane %v13_v14, %v33_v12 }
   0x9   :  { %v138_v27 = vrot.slane %v108_v15, %v107_v8  ;;  %v142_v28 = vrot.slane %v112_v16, %v107_v8  ;;  %v146_v29 = vrot.slane %v116_v17, %v107_v8  ;;  %v150_v30 = vrot.slane %v120_v18, %v107_v8 }
   0xa   :  { %554 = vset.pattern.permute.xlu1 %v591_v4  ;;  %553 = vset.pattern.permute.xlu0 %v591_v4  ;;  %v64_v31 = vrot.slane %v34_v19, %v33_v12  ;;  %v68_v32 = vrot.slane %v38_v20, %v33_v12  ;;  %v72_v33 = vrot.slane %v42_v21, %v33_v12 }
   0xb   :  { %188 = vperm.xlu1 %554, %v620_v3   ;;  %184 = vperm.xlu0 %553, %v613_v2   ;;  %v76_v35 = vrot.slane %v46_v22, %v33_v12  ;;  %v194_v36 = vrot.slane %v11_v10, %v193_v23  ;;  %v198_v37 = vrot.slane %v11_v10, %v197_v24 }
   0xc   :  { %v202_v38 = vrot.slane %v12_v11, %v193_v23  ;;  %v280_v39 = vrot.slane %v11_v10, %v279_v25  ;;  %v284_v40 = vrot.slane %v11_v10, %v283_v26  ;;  %v288_v41 = vrot.slane %v12_v11, %v279_v25 }
   0xd   :  { %v50_v42 = vrot.slane %v13_v14, %v37_v13  ;;  %v54_v43 = vrot.slane %v14_v34, %v33_v12  ;;  %v124_v44 = vrot.slane %v13_v14, %v111_v9  ;;  %v128_v45 = vrot.slane %v14_v34, %v107_v8 }
   0xe   :  { %v206_v46 = vrot.slane %v13_v14, %v193_v23  ;;  %v210_v47 = vrot.slane %v13_v14, %v197_v24  ;;  %v214_v48 = vrot.slane %v14_v34, %v193_v23  ;;  %v292_v49 = vrot.slane %v13_v14, %v279_v25 }
   0xf   :  { %555 = vset.pattern.permute.xlu1 %v592_v5  ;;  %556 = vset.pattern.permute.xlu0 %v592_v5  ;;  %v296_v50 = vrot.slane %v13_v14, %v283_v26  ;;  %v640_v51 = vrot.slane %v194_v36, %v193_v23  ;;  %v642_v52 = vrot.slane %v198_v37, %v193_v23 }
  0x10   :  { %270 = vperm.xlu1 %555, %v613_v2   ;;  %274 = vperm.xlu0 %556, %v620_v3   ;;  %v644_v53 = vrot.slane %v202_v38, %v193_v23  ;;  %v300_v54 = vrot.slane %v14_v34, %v279_v25  ;;  %v646_v57 = vrot.slane %v280_v39, %v279_v25 }
  0x11   :  { %v648_v58 = vrot.slane %v284_v40, %v279_v25  ;;  %v650_v59 = vrot.slane %v288_v41, %v279_v25  ;;  %v80_v60 = vrot.slane %v50_v42, %v33_v12  ;;  %v84_v61 = vrot.slane %v54_v43, %v33_v12 }
  0x12   :  { %v154_v62 = vrot.slane %v124_v44, %v107_v8  ;;  %v158_v63 = vrot.slane %v128_v45, %v107_v8  ;;  %v652_v0 = vrot.slane %v206_v46, %v193_v23  ;;  %v654_v1 = vrot.slane %v210_v47, %v193_v23 }
  0x13   :  { %v656_v4 = vrot.slane %v214_v48, %v193_v23  ;;  %v658_v5 = vrot.slane %v292_v49, %v279_v25  ;;  %v660_v6 = vrot.slane %v296_v50, %v279_v25  ;;  %v662_v11 = vrot.slane %v300_v54, %v279_v25 }
  0x7d   :  { %v99_v55 = vpop.permute.xlu1 %98  ;;  %v20_v56 = vpop.permute.xlu0 %19 }
  0x7e   :  { %v159_v7 = vmul.f32 %v138_v27, %v99_v55  ;;  %v160_v9 = vmul.f32 %v142_v28, %v99_v55  ;;  %v161_v10 = vmul.f32 %v146_v29, %v99_v55  ;;  %v165_v13 = vmul.f32 %v150_v30, %v99_v55 }
  0x7f   :  { %v85_v14 = vmul.f32 %v64_v31, %v20_v56  ;;  %v86_v12 = vmul.f32 %v68_v32, %v20_v56  ;;  %v87_v15 = vmul.f32 %v72_v33, %v20_v56  ;;  %v91_v17 = vmul.f32 %v76_v35, %v20_v56 }
  0x80   :  { %v92_v18 = vmul.f32 %v80_v60, %v20_v56  ;;  %v93_v19 = vmul.f32 %v84_v61, %v20_v56  ;;  %v166_v20 = vmul.f32 %v154_v62, %v99_v55  ;;  %v167_v46 = vmul.f32 %v158_v63, %v99_v55 }
  0x81   :  { %v103_v8 = vpop.permute.xlu1 %102  ;;  %v25_v16 = vpop.permute.xlu0 %24  ;;  %v171_v41 = vadd.f32 %v159_v7, %v85_v14  ;;  %v172_v42 = vadd.f32 %v160_v9, %v86_v12  ;;  %v173_v43 = vadd.f32 %v161_v10, %v87_v15 }
  0x82   :  { %v162_v21 = vmul.f32 %v138_v27, %v103_v8  ;;  %v163_v22 = vmul.f32 %v142_v28, %v103_v8  ;;  %v164_v23 = vmul.f32 %v146_v29, %v103_v8  ;;  %v88_v24 = vmul.f32 %v64_v31, %v25_v16 }
  0x83   :  { %v168_v26 = vmul.f32 %v150_v30, %v103_v8  ;;  %v89_v34 = vmul.f32 %v68_v32, %v25_v16  ;;  %v90_v36 = vmul.f32 %v72_v33, %v25_v16  ;;  %v94_v37 = vmul.f32 %v76_v35, %v25_v16 }
  0x84   :  { %v95_v25 = vmul.f32 %v80_v60, %v25_v16  ;;  %v96_v38 = vmul.f32 %v84_v61, %v25_v16  ;;  %v169_v39 = vmul.f32 %v154_v62, %v103_v8  ;;  %v170_v40 = vmul.f32 %v158_v63, %v103_v8 }
  0x85   :  { %v174_v47 = vadd.f32 %v162_v21, %v88_v24  ;;  %v177_v29 = vadd.f32 %v165_v13, %v91_v17  ;;  %v175_v30 = vadd.f32 %v163_v22, %v89_v34  ;;  %v176_v35 = vadd.f32 %v164_v23, %v90_v36 }
  0x86   :  { %v189_v44 = vpop.permute.xlu1 %188  ;;  %v185_v45 = vpop.permute.xlu0 %184  ;;  %v180_v48 = vadd.f32 %v168_v26, %v94_v37  ;;  %v181_v49 = vadd.f32 %v169_v39, %v95_v25  ;;  %v182_v50 = vadd.f32 %v170_v40, %v96_v38  ;;  %v178_v56 = vadd.f32 %v166_v20, %v92_v18 }
  0x87   :  { %v248_v27 = vmul.f32 %v640_v51, %v189_v44  ;;  %v249_v28 = vmul.f32 %v642_v52, %v189_v44  ;;  %v250_v31 = vmul.f32 %v644_v53, %v189_v44  ;;  %v254_v32 = vmul.f32 %v652_v0, %v189_v44 }
  0x88   :  { %v255_v33 = vmul.f32 %v654_v1, %v189_v44  ;;  %v245_v54 = vmul.f32 %v640_v51, %v185_v45  ;;  %v246_v55 = vmul.f32 %v642_v52, %v185_v45  ;;  %v179_v60 = vadd.f32 %v167_v46, %v93_v19 }
  0x89   :  { %v247_v61 = vmul.f32 %v644_v53, %v185_v45  ;;  %v256_v7 = vmul.f32 %v656_v4, %v189_v44  ;;  %v260_v9 = vadd.f32 %v248_v27, %v174_v47  ;;  %v261_v10 = vadd.f32 %v249_v28, %v175_v30 }
  0x8a   :  { %v262_v14 = vadd.f32 %v250_v31, %v176_v35  ;;  %v266_v12 = vadd.f32 %v254_v32, %v180_v48  ;;  %v267_v15 = vadd.f32 %v255_v33, %v181_v49  ;;  %v251_v52 = vmul.f32 %v652_v0, %v185_v45 }
  0x8b   :  { %v271_v62 = vpop.permute.xlu1 %270  ;;  %v275_v63 = vpop.permute.xlu0 %274  ;;  %v252_v16 = vmul.f32 %v654_v1, %v185_v45  ;;  %v268_v20 = vadd.f32 %v256_v7, %v182_v50  ;;  %v257_v26 = vadd.f32 %v245_v54, %v171_v41  ;;  %v258_v34 = vadd.f32 %v246_v55, %v172_v42 }
  0x8c   :  { %v334_v13 = vmul.f32 %v646_v57, %v275_v63  ;;  %v335_v8 = vmul.f32 %v648_v58, %v275_v63  ;;  %v336_v51 = vmul.f32 %v650_v59, %v275_v63  ;;  %v331_v53 = vmul.f32 %v646_v57, %v271_v62 }
  0x8d   :  { %v332_v17 = vmul.f32 %v648_v58, %v271_v62  ;;  %v333_v18 = vmul.f32 %v650_v59, %v271_v62  ;;  %v340_v21 = vmul.f32 %v658_v5, %v275_v63  ;;  %v342_v24 = vmul.f32 %v662_v11, %v275_v63 }
  0x8e   :  { %v346_v19 = vadd.f32 %v334_v13, %v260_v9  ;;  %v347_v22 = vadd.f32 %v335_v8, %v261_v10  ;;  %v348_v23 = vadd.f32 %v336_v51, %v262_v14  ;;  %v259_v36 = vadd.f32 %v247_v61, %v173_v43 }
  0x8f   :  { %v341_v0 = vmul.f32 %v660_v6, %v275_v63  ;;  %v253_v58 = vmul.f32 %v656_v4, %v185_v45  ;;  %v337_v59 = vmul.f32 %v658_v5, %v271_v62  ;;  %v343_v37 = vadd.f32 %v331_v53, %v257_v26 }
  0x90   :  { %v365_v1 = vadd.f32 %v347_v22, %v346_v19  ;;  %v366_v57 = vsel %vm356_vm0, %v348_v23, 0.0  ;;  %v344_v25 = vadd.f32 %v332_v17, %v258_v34  ;;  %v345_v38 = vadd.f32 %v333_v18, %v259_v36 }
  0x91   :  { %v352_v39 = vadd.f32 %v340_v21, %v266_v12  ;;  %v263_v44 = vadd.f32 %v251_v52, %v177_v29  ;;  %v339_v46 = vmul.f32 %v662_v11, %v271_v62  ;;  %v354_v41 = vadd.f32 %v342_v24, %v268_v20 }
  0x92   :  { %v367_v40 = vadd.f32 %v366_v57, %v365_v1  ;;  %v338_v42 = vmul.f32 %v660_v6, %v271_v62  ;;  %v355_v43 = vadd.f32 %v344_v25, %v343_v37  ;;  %v357_v47 = vsel %vm356_vm0, %v345_v38, 0.0 }
  0x93   :  { %v353_v27 = vadd.f32 %v341_v0, %v267_v15  ;;  %v265_v30 = vadd.f32 %v253_v58, %v179_v60  ;;  %v264_v4 = vadd.f32 %v252_v16, %v178_v56  ;;  %v349_v45 = vadd.f32 %v337_v59, %v263_v44 }
  0x94   :  { %v368_v28 = vadd.f32 %v367_v40, %v352_v39  ;;  %v358_v5 = vadd.f32 %v357_v47, %v355_v43  ;;  %v370_v33 = vsel %vm356_vm0, %v354_v41, 0.0 }
  0x95   :  { %v351_v32 = vadd.f32 %v339_v46, %v265_v30  ;;  %v350_v35 = vadd.f32 %v338_v42, %v264_v4  ;;  %v593_v46 = vmov 4  }
  0x96   :  { %v369_v31 = vadd.f32 %v368_v28, %v353_v27  ;;  %v359_v29 = vadd.f32 %v358_v5, %v349_v45  ;;  %557 = vset.pattern.permute.xlu1 %v593_v46  ;;  %558 = vset.pattern.permute.xlu0 %v593_v46 }
  0x97   :  { %v361_v6 = vsel %vm356_vm0, %v351_v32, 0.0 }
  0x98   :  { %v371_v48 = vadd.f32 %v370_v33, %v369_v31  ;;  %v360_v11 = vadd.f32 %v359_v29, %v350_v35  ;;  %v594_v31 = vmov 5  }
  0x9a   :  { %372 = vadd.xlane.f32.xlu0 %v371_v48  ;;  %v362_v49 = vadd.f32 %v361_v6, %v360_v11 }
  0x9c   :  { %363 = vadd.xlane.f32.xlu1 %v362_v49 }
 0x123   :  { %v373_v50 = vpop.xlane.xlu0 %372 }
 0x124   :  { %v376_v54 = vmul.f32 0.0018382353, %v373_v50 }
 0x125   :  { %v364_v55 = vpop.xlane.xlu1 %363 }
 0x126   :  { %v692_v60 = vsub.f32 %v346_v19, %v376_v54  ;;  %v694_v56 = vsub.f32 %v347_v22, %v376_v54  ;;  %v696_v61 = vsub.f32 %v348_v23, %v376_v54  ;;  %v375_v62 = vmul.f32 0.0018382353, %v364_v55 }
 0x127   :  { %v698_v63 = vsub.f32 %v352_v39, %v376_v54  ;;  %v706_v13 = vsub.f32 %v353_v27, %v376_v54  ;;  %v708_v14 = vsub.f32 %v354_v41, %v376_v54 }
 0x128   :  { %v392_v7 = vmul.f32 %v692_v60, %v692_v60  ;;  %v393_v9 = vmul.f32 %v694_v56, %v694_v56  ;;  %v394_v10 = vmul.f32 %v696_v61, %v696_v61  ;;  %v377_v12 = vsub.f32 %v343_v37, %v375_v62 }
 0x129   :  { %v378_v15 = vsub.f32 %v344_v25, %v375_v62  ;;  %v379_v52 = vsub.f32 %v345_v38, %v375_v62  ;;  %v398_v16 = vmul.f32 %v698_v63, %v698_v63  ;;  %v383_v18 = vsub.f32 %v349_v45, %v375_v62 }
 0x12a   :  { %v410_v8 = vadd.f32 %v393_v9, %v392_v7  ;;  %v411_v51 = vsel %vm356_vm0, %v394_v10, 0.0  ;;  %v389_v53 = vmul.f32 %v377_v12, %v377_v12  ;;  %v399_v21 = vmul.f32 %v706_v13, %v706_v13 }
 0x12b   :  { %v390_v19 = vmul.f32 %v378_v15, %v378_v15  ;;  %v391_v20 = vmul.f32 %v379_v52, %v379_v52  ;;  %v400_v22 = vmul.f32 %v708_v14, %v708_v14  ;;  %v385_v23 = vsub.f32 %v351_v32, %v375_v62 }
 0x12c   :  { %v412_v17 = vadd.f32 %v411_v51, %v410_v8  ;;  %v384_v26 = vsub.f32 %v350_v35, %v375_v62  ;;  %v395_v1 = vmul.f32 %v383_v18, %v383_v18 }
 0x12d   :  { %v401_v34 = vadd.f32 %v390_v19, %v389_v53  ;;  %v402_v36 = vsel %vm356_vm0, %v391_v20, 0.0  ;;  %v415_v58 = vsel %vm356_vm0, %v400_v22, 0.0  ;;  %v397_v59 = vmul.f32 %v385_v23, %v385_v23 }
 0x12e   :  { %v413_v24 = vadd.f32 %v412_v17, %v398_v16  ;;  %v396_v25 = vmul.f32 %v384_v26, %v384_v26 }
 0x12f   :  { %v403_v57 = vadd.f32 %v402_v36, %v401_v34  ;;  %v406_v40 = vsel %vm356_vm0, %v397_v59, 0.0 }
 0x130   :  { %v414_v0 = vadd.f32 %v413_v24, %v399_v21 }
 0x131   :  { %v404_v38 = vadd.f32 %v403_v57, %v395_v1 }
 0x132   :  { %v416_v37 = vadd.f32 %v415_v58, %v414_v0 }
 0x133   :  { %v405_v39 = vadd.f32 %v404_v38, %v396_v25 }
 0x134   :  { %417 = vadd.xlane.f32.xlu0 %v416_v37 }
 0x135   :  { %v407_v44 = vadd.f32 %v406_v40, %v405_v39 }
 0x137   :  { %408 = vadd.xlane.f32.xlu1 %v407_v44 }
 0x1bd   :  { %v418_v41 = vpop.xlane.xlu0 %417 }
 0x1be   :  { %v420_v42 = vmul.f32 0.0018382353, %v418_v41 }
 0x1c0   :  { %v422_v43 = vadd.f32 1e-05, %v420_v42  ;;  %v409_v47 = vpop.xlane.xlu1 %408 }
 0x1c1   :  { %v419_v27 = vmul.f32 0.0018382353, %v409_v47 }
 0x1c2   :  { %561 = vrsqrt.f32 %v422_v43 }
 0x1c3   :  { %v421_v28 = vadd.f32 1e-05, %v419_v27 }
 0x1c5   :  { %563 = vrsqrt.f32 %v421_v28 }
 0x1cf   :  { %v562_v30 = vpop.eup %561 }
 0x1d0   :  { %v426_v4 = vmul.f32 %v562_v30, %v620_v3 }
 0x1d2   :  { %434 = vperm.xlu0 %558, %v426_v4   ;;  %v564_v45 = vpop.eup %563 }
 0x1d3   :  { %v425_v5 = vmul.f32 %v564_v45, %v613_v2 }
 0x1d5   :  { %429 = vperm.xlu1 %557, %v425_v5  }
 0x1d6   :  { %560 = vset.pattern.permute.xlu0 %v594_v31 }
 0x1d9   :  { %559 = vset.pattern.permute.xlu1 %v594_v31 }
 0x1da   :  { %450 = vperm.xlu1 %559, %v613_v2  }
 0x1de   :  { %454 = vperm.xlu1 %559, %v620_v3  }
 0x24d   :  { %v435_v11 = vpop.permute.xlu0 %434 }
 0x24e   :  { %v440_v10 = vmul.f32 %v435_v11, %v692_v60  ;;  %v441_v2 = vmul.f32 %v435_v11, %v694_v56  ;;  %v442_v3 = vmul.f32 %v435_v11, %v696_v61  ;;  %v447_v16 = vmul.f32 %v435_v11, %v706_v13 }
 0x24f   :  { %v448_v60 = vmul.f32 %v435_v11, %v708_v14 }
 0x250   :  { %v430_v32 = vpop.permute.xlu1 %429 }
 0x251   :  { %v437_v33 = vmul.f32 %v430_v32, %v377_v12  ;;  %v438_v35 = vmul.f32 %v430_v32, %v378_v15  ;;  %v439_v29 = vmul.f32 %v430_v32, %v379_v52  ;;  %v443_v48 = vmul.f32 %v430_v32, %v383_v18 }
 0x252   :  { %v444_v6 = vmul.f32 %v430_v32, %v384_v26  ;;  %v445_v49 = vmul.f32 %v430_v32, %v385_v23  ;;  %v446_v12 = vmul.f32 %v435_v11, %v698_v63 }
 0x255   :  { %v451_v50 = vpop.permute.xlu1 %450 }
 0x256   :  { %v457_v54 = vadd.f32 %v451_v50, %v437_v33  ;;  %v458_v55 = vadd.f32 %v451_v50, %v438_v35  ;;  %v459_v62 = vadd.f32 %v451_v50, %v439_v29  ;;  %v463_v7 = vadd.f32 %v451_v50, %v443_v48 }
 0x257   :  { %v464_v9 = vadd.f32 %v451_v50, %v444_v6  ;;  %v465_v8 = vadd.f32 %v451_v50, %v445_v49 }
 0x258   :  { %v481_v15 = vmul.f32 0.70710677, %v457_v54  ;;  %v482_v51 = vmul.f32 0.70710677, %v458_v55  ;;  %v483_v53 = vmul.f32 0.70710677, %v459_v62 }
 0x259   :  { %v455_v52 = vpop.permute.xlu1 %454  ;;  %v487_v17 = vmul.f32 0.70710677, %v463_v7  ;;  %v488_v18 = vmul.f32 0.70710677, %v464_v9  ;;  %v489_v56 = vmul.f32 0.70710677, %v465_v8 }
 0x25a   :  { %565 = verf.f32 %v481_v15  ;;  %v460_v19 = vadd.f32 %v455_v52, %v440_v10  ;;  %v461_v20 = vadd.f32 %v455_v52, %v441_v2  ;;  %v462_v21 = vadd.f32 %v455_v52, %v442_v3 }
 0x25b   :  { %567 = verf.f32 %v482_v51  ;;  %v466_v22 = vadd.f32 %v455_v52, %v446_v12  ;;  %v730_v61 = vadd.f32 %v455_v52, %v447_v16  ;;  %v732_v63 = vadd.f32 %v455_v52, %v448_v60 }
 0x25c   :  { %569 = verf.f32 %v483_v53  ;;  %v484_v13 = vmul.f32 0.70710677, %v460_v19  ;;  %v485_v23 = vmul.f32 0.70710677, %v461_v20  ;;  %v486_v24 = vmul.f32 0.70710677, %v462_v21 }
 0x25d   :  { %571 = verf.f32 %v487_v17  ;;  %v490_v26 = vmul.f32 0.70710677, %v466_v22  ;;  %v491_v34 = vmul.f32 0.70710677, %v730_v61  ;;  %v492_v14 = vmul.f32 0.70710677, %v732_v63 }
 0x25e   :  { %573 = verf.f32 %v488_v18  ;;  %v469_v1 = vmul.f32 0.5, %v457_v54  ;;  %v470_v59 = vmul.f32 0.5, %v458_v55  ;;  %v471_v38 = vmul.f32 0.5, %v459_v62 }
 0x25f   :  { %575 = verf.f32 %v489_v56  ;;  %v475_v46 = vmul.f32 0.5, %v463_v7  ;;  %v476_v47 = vmul.f32 0.5, %v464_v9  ;;  %v477_v4 = vmul.f32 0.5, %v465_v8 }
 0x260   :  { %577 = verf.f32 %v484_v13  ;;  %v472_v33 = vmul.f32 0.5, %v460_v19  ;;  %v473_v11 = vmul.f32 0.5, %v461_v20  ;;  %v474_v50 = vmul.f32 0.5, %v462_v21 }
 0x261   :  { %579 = verf.f32 %v485_v23  ;;  %v478_v7 = vmul.f32 0.5, %v466_v22  ;;  %v479_v8 = vmul.f32 0.5, %v730_v61  ;;  %v480_v15 = vmul.f32 0.5, %v732_v63 }
 0x262   :  { %581 = verf.f32 %v486_v24 }
 0x263   :  { %583 = verf.f32 %v490_v26 }
 0x264   :  { %585 = verf.f32 %v491_v34 }
 0x265   :  { %587 = verf.f32 %v492_v14 }
 0x267   :  { %v566_v36 = vpop.eup %565 }
 0x268   :  { %v568_v0 = vpop.eup %567  ;;  %v505_v57 = vadd.f32 1.0, %v566_v36 }
 0x269   :  { %v570_v58 = vpop.eup %569  ;;  %v506_v37 = vadd.f32 1.0, %v568_v0 }
 0x26a   :  { %v572_v25 = vpop.eup %571  ;;  %v507_v39 = vadd.f32 1.0, %v570_v58  ;;  %v517_v40 = vmul.f32 %v505_v57, %v469_v1 }
 0x26b   :  { %v574_v44 = vpop.eup %573  ;;  %v511_v41 = vadd.f32 1.0, %v572_v25  ;;  %v518_v42 = vmul.f32 %v506_v37, %v470_v59 }
 0x26c   :  { %v576_v43 = vpop.eup %575  ;;  %v512_v27 = vadd.f32 1.0, %v574_v44  ;;  %v519_v28 = vmul.f32 %v507_v39, %v471_v38  ;;  %529 = vst [vmem:[%s780_s2] sm:$0xff] %v517_v40 }
 0x26d   :  { %v578_v30 = vpop.eup %577  ;;  %v513_v45 = vadd.f32 1.0, %v576_v43  ;;  %v523_v5 = vmul.f32 %v511_v41, %v475_v46  ;;  %530 = vst [vmem:[%s780_s2 + $0x8] sm:$0xff] %v518_v42 }
 0x26e   :  { %v580_v31 = vpop.eup %579  ;;  %v524_v32 = vmul.f32 %v512_v27, %v476_v47  ;;  %531 = vst.msk [vmem:[%s780_s2 + $0x10] sm:$0xff] %vm356_vm0, %v519_v28  ;;  %v508_v35 = vadd.f32 1.0, %v578_v30 }
 0x26f   :  { %v582_v29 = vpop.eup %581  ;;  %v525_v48 = vmul.f32 %v513_v45, %v477_v4  ;;  %535 = vst [vmem:[%s780_s2 + $0x30] sm:$0xff] %v523_v5  ;;  %v509_v6 = vadd.f32 1.0, %v580_v31 }
 0x270   :  { %v584_v49 = vpop.eup %583  ;;  %536 = vst [vmem:[%s780_s2 + $0x38] sm:$0xff] %v524_v32  ;;  %v510_v54 = vadd.f32 1.0, %v582_v29  ;;  %v520_v55 = vmul.f32 %v508_v35, %v472_v33 }
 0x271   :  { %v586_v62 = vpop.eup %585  ;;  %537 = vst.msk [vmem:[%s780_s2 + $0x40] sm:$0xff] %vm356_vm0, %v525_v48  ;;  %v514_v9 = vadd.f32 1.0, %v584_v49  ;;  %v521_v10 = vmul.f32 %v509_v6, %v473_v11 }
 0x272   :  { %v588_v2 = vpop.eup %587  ;;  %v515_v3 = vadd.f32 1.0, %v586_v62  ;;  %v522_v12 = vmul.f32 %v510_v54, %v474_v50  ;;  %532 = vst [vmem:[%s780_s2 + $0x18] sm:$0xff] %v520_v55 }
 0x273   :  { %v516_v51 = vadd.f32 1.0, %v588_v2  ;;  %v526_v52 = vmul.f32 %v514_v9, %v478_v7  ;;  %533 = vst [vmem:[%s780_s2 + $0x20] sm:$0xff] %v521_v10 }
 0x274   :  { %v527_v16 = vmul.f32 %v515_v3, %v479_v8  ;;  %534 = vst.msk [vmem:[%s780_s2 + $0x28] sm:$0xff] %vm356_vm0, %v522_v12 }
 0x275   :  { %v528_v53 = vmul.f32 %v516_v51, %v480_v15  ;;  %538 = vst [vmem:[%s780_s2 + $0x48] sm:$0xff] %v526_v52 }
 0x276   :  { %539 = vst [vmem:[%s780_s2 + $0x50] sm:$0xff] %v527_v16 }
 0x277   :  { %540 = vst.msk [vmem:[%s780_s2 + $0x58] sm:$0xff] %vm356_vm0, %v528_v53 }

</bundles_post_ra>
